<compile_context>
chip_gen: v6e
topology: v6e:2x2x1
jax: 0.10.0
libtpu: 0.0.40
codegen_flags: <defaults>
</compile_context>

<pallas_src>
import functools

import jax
import jax.numpy as jnp
import numpy as np
from jax import lax
from jax.experimental import pallas as pl
from jax.experimental.pallas import tpu as pltpu


# ----------------------------- Pallas kernels -------------------------------- #
def _gelu(h, approximate):
    if approximate:
        c = np.float32(np.sqrt(2.0 / np.pi))
        return 0.5 * h * (1.0 + jnp.tanh(c * (h + np.float32(0.044715) * h * h * h)))
    # exact (erf-based) GELU, matching torch.nn.GELU() default
    return 0.5 * h * (1.0 + lax.erf(h * np.float32(1.0 / np.sqrt(2.0))))


def _mask_output(thresh_ref, y):
    tm, d = y.shape
    cols = lax.broadcasted_iota(jnp.int32, (tm, d), 1)
    return jnp.where(cols < thresh_ref[...], y, jnp.zeros_like(y))


def nested_ffn_kernel_resident(thresh_ref, x_ref, w1_ref, b1_ref, w2_ref, b2_ref,
                               o_ref, *, approximate_gelu):
    # Weights are VMEM-resident (constant index_map -> fetched from HBM once).
    # x was already column-masked to its nested width in the wrapper.
    h = jnp.dot(x_ref[...], w1_ref[...], preferred_element_type=jnp.float32) + b1_ref[...]
    h = _gelu(h, approximate_gelu)
    y = jnp.dot(h.astype(w2_ref.dtype), w2_ref[...],
                preferred_element_type=jnp.float32) + b2_ref[...]
    o_ref[...] = _mask_output(thresh_ref, y).astype(o_ref.dtype)


def nested_ffn_kernel_htiled(thresh_ref, x_ref, w1_ref, b1_ref, w2_ref, b2_ref,
                             o_ref, acc_ref, *, approximate_gelu):
    # Fallback when the weights do not fit in VMEM: hidden dim tiled as a reduction
    # axis, f32 accumulator resident across it.
    j = pl.program_id(1)

    @pl.when(j == 0)
    def _init():
        acc_ref[...] = jnp.zeros_like(acc_ref)

    h = jnp.dot(x_ref[...], w1_ref[...], preferred_element_type=jnp.float32) + b1_ref[...]
    h = _gelu(h, approximate_gelu)
    acc_ref[...] += jnp.dot(h.astype(w2_ref.dtype), w2_ref[...],
                            preferred_element_type=jnp.float32)

    @pl.when(j == pl.num_programs(1) - 1)
    def _finalize():
        y = acc_ref[...] + b2_ref[...]
        o_ref[...] = _mask_output(thresh_ref, y).astype(o_ref.dtype)


# ----------------------------- tiling helpers -------------------------------- #
def _round_up(n, m):
    return ((n + m - 1) // m) * m


def _vmem_budget():
    """~0.75x of the physical per-core VMEM (v5e/v6e: 128 MiB, v7x: 64 MiB)."""
    try:
        cap = int(pltpu.get_tpu_info().vmem_capacity_bytes)
    except Exception:
        cap = 64 * 1024 * 1024  # v7x-safe floor
    return max(int(0.75 * cap), 24 * 1024 * 1024)


def _estimate_vmem(tm, th, d, cbytes, obytes, resident):
    def lanes(n):
        return _round_up(n, 128)
    est = 0
    est += 2 * tm * lanes(1) * 4              # per-token nested width (i32), 2x buffered
    est += 2 * tm * lanes(d) * cbytes         # x tile, 2x buffered
    est += 2 * d * lanes(th) * cbytes         # W1^T tile (counted 2x even if resident)
    est += 2 * 8 * lanes(th) * 4              # b1
    est += 2 * th * lanes(d) * cbytes         # W2^T tile
    est += 2 * 8 * lanes(d) * 4               # b2
    est += 2 * tm * lanes(d) * obytes         # output tile, 2x buffered
    est += tm * lanes(th) * (4 + cbytes)      # hidden intermediate (f32 + narrow cast)
    if not resident:
        est += tm * lanes(d) * 4              # f32 accumulator scratch
    return int(est * 1.15) + (1 << 20)        # margin + internal scratch slack


def _choose_tiling(n_tokens, d, h, tm_req, cbytes, obytes, budget):
    tm0 = min(_round_up(max(tm_req, 8), 8), _round_up(n_tokens, 8))
    tms, t = [], tm0
    while True:
        tms.append(t)
        if t <= 8:
            break
        t = max(8, _round_up(t // 2, 8))
    # 1) weight-resident single-pass: full weight set read from HBM exactly once.
    for tm in tms:
        if _estimate_vmem(tm, h, d, cbytes, obytes, resident=True) <= budget:
            return tm, h, True
    # 2) H-tiled fallback (prefer multiples of 256 for the 2x256^2 MXU).
    ths = [c for c in range(min(h, 2048), 255, -256) if h % c == 0]
    ths += [c for c in range(min(h, 2048), 127, -128) if h % c == 0 and c not in ths]
    if not ths:
        ths = [h]
    for tm in tms:                            # big tm first: fewer weight re-streams
        for th in ths:
            if _estimate_vmem(tm, th, d, cbytes, obytes, resident=False) <= budget:
                return tm, th, False
    return 8, ths[-1], False


# ------------------------------ JAX wrapper ---------------------------------- #
def nested_feed_forward(x, token_mask, w1, b1, w2, b2, *, num_experts=4,
                        tm=512, compute_dtype=jnp.bfloat16, out_dtype=None,
                        approximate_gelu=False):
    """x: (B,S,D); token_mask: (B,S) int expert ids; w1: (D*E, D); w2: (D, D*E)."""
    B, S, D = x.shape
    H = w1.shape[0]
    N = B * S
    out_dtype = x.dtype if out_dtype is None else out_dtype
    cbytes = jnp.dtype(compute_dtype).itemsize
    obytes = jnp.dtype(out_dtype).itemsize

    budget = _vmem_budget()
    tm, th, resident = _choose_tiling(N, D, H, tm, cbytes, obytes, budget)

    # Keep both v7x TensorCores busy when the token count is small (>= 2 token tiles).
    if (_round_up(N, tm) // tm) < 2 and tm >= 16:
        tm = max(8, _round_up(tm // 2, 8))

    Npad = _round_up(N, tm)
    n_tiles = Npad // tm

    # Per-token nested width D_m = D >> (E - 1 - m).
    thresh = jnp.right_shift(
        jnp.int32(D), (num_experts - 1) - token_mask.astype(jnp.int32)).reshape(N, 1)

    # Input column mask applied here: fuses with the dtype cast in XLA and removes the
    # per-H-step mask/select work from the kernel (perf feedback).
    cols = jnp.arange(D, dtype=jnp.int32)[None, :]
    xf = jnp.where(cols < thresh, x.reshape(N, D), 0.0).astype(compute_dtype)

    if Npad != N:
        pad = Npad - N
        xf = jnp.pad(xf, ((0, pad), (0, 0)))
        thresh = jnp.pad(thresh, ((0, pad), (0, 0)))   # padded tokens fully masked

    w1t = w1.T.astype(compute_dtype)                   # (D, H)
    w2t = w2.T.astype(compute_dtype)                   # (H, D)
    b1r = b1.reshape(1, H).astype(jnp.float32)
    b2r = b2.reshape(1, D).astype(jnp.float32)

    weight_passes = 1 if resident else n_tiles
    cost = pl.CostEstimate(
        flops=4 * Npad * D * H,                        # two matmuls
        transcendentals=Npad * H,                      # one erf/tanh per hidden element
        bytes_accessed=(Npad * D * (cbytes + obytes) + Npad * 4
                        + weight_passes * 2 * D * H * cbytes
                        + (H + D) * 4),
    )

    if resident:
        kernel = functools.partial(nested_ffn_kernel_resident,
                                   approximate_gelu=approximate_gelu)
        grid_spec = pltpu.PrefetchScalarGridSpec(
            num_scalar_prefetch=0,
            grid=(n_tiles,),
            in_specs=[
                pl.BlockSpec((tm, 1), lambda i: (i, 0)),   # D_m per token
                pl.BlockSpec((tm, D), lambda i: (i, 0)),   # x tile (pre-masked)
                pl.BlockSpec((D, H), lambda i: (0, 0)),    # W1^T, VMEM-resident
                pl.BlockSpec((1, H), lambda i: (0, 0)),    # b1, resident
                pl.BlockSpec((H, D), lambda i: (0, 0)),    # W2^T, resident
                pl.BlockSpec((1, D), lambda i: (0, 0)),    # b2, resident
            ],
            out_specs=pl.BlockSpec((tm, D), lambda i: (i, 0)),
        )
        dims = ("parallel",)
    else:
        kernel = functools.partial(nested_ffn_kernel_htiled,
                                   approximate_gelu=approximate_gelu)
        grid_spec = pltpu.PrefetchScalarGridSpec(
            num_scalar_prefetch=0,
            grid=(n_tiles, H // th),
            in_specs=[
                pl.BlockSpec((tm, 1), lambda i, j: (i, 0)),
                pl.BlockSpec((tm, D), lambda i, j: (i, 0)),
                pl.BlockSpec((D, th), lambda i, j: (0, j)),
                pl.BlockSpec((1, th), lambda i, j: (0, j)),
                pl.BlockSpec((th, D), lambda i, j: (j, 0)),
                pl.BlockSpec((1, D), lambda i, j: (0, 0)),
            ],
            out_specs=pl.BlockSpec((tm, D), lambda i, j: (i, 0)),
            scratch_shapes=[pltpu.VMEM((tm, D), jnp.float32)],
        )
        dims = ("parallel", "arbitrary")

    out = pl.pallas_call(
        kernel,
        out_shape=jax.ShapeDtypeStruct((Npad, D), out_dtype),
        grid_spec=grid_spec,
        compiler_params=pltpu.CompilerParams(
            dimension_semantics=dims,
            vmem_limit_bytes=budget,
        ),
        cost_estimate=cost,
    )(thresh, xf, w1t, b1r, w2t, b2r)
    return out[:N].reshape(B, S, D)


# --------------------------- pure-JAX reference ------------------------------ #
def nested_feed_forward_ref(x, token_mask, w1, b1, w2, b2, *, num_experts=4):
    """Mirrors the per-expert loop of the PyTorch module (dense select per expert)."""
    B, S, D = x.shape
    N = B * S
    xf = x.reshape(N, D)
    mf = token_mask.reshape(N)
    out = jnp.zeros((N, D), x.dtype)
    for m in range(num_experts):
        Dm = D >> (num_experts - m - 1)
        sel = mf == m
        xm = jnp.where(jnp.arange(D) < Dm, xf, 0.0)          # x[:, :Dm] zero-extended
        h = jnp.dot(xm, w1.T, precision=lax.Precision.HIGHEST) + b1
        h = jax.nn.gelu(h, approximate=False)                # exact GELU
        y = jnp.dot(h, w2[:Dm, :].T, precision=lax.Precision.HIGHEST) + b2[:Dm]
        y = jnp.pad(y, ((0, 0), (0, D - Dm)))                # zero pad to D
        out = jnp.where(sel[:, None], y, out)
    return out.reshape(B, S, D)


# ---------------------------------- main ------------------------------------- #
if __name__ == "__main__":
    batch, seq, dim = 2, 8, 32
    expansion_factor = 4
    num_experts = 4
    hidden = dim * expansion_factor

    key = jax.random.PRNGKey(0)
    kx, km, kw1, kb1, kw2, kb2 = jax.random.split(key, 6)

    x = jax.random.normal(kx, (batch, seq, dim), dtype=jnp.float32)
    token_mask = jax.random.randint(km, (batch, seq), 0, num_experts, dtype=jnp.int32)

    # deterministic synthetic parameters (nn.Linear layout: (out_features, in_features))
    w1 = jax.random.normal(kw1, (hidden, dim), dtype=jnp.float32) * 0.05
    b1 = jax.random.normal(kb1, (hidden,), dtype=jnp.float32) * 0.05
    w2 = jax.random.normal(kw2, (dim, hidden), dtype=jnp.float32) * 0.05
    b2 = jax.random.normal(kb2, (dim,), dtype=jnp.float32) * 0.05

    ref = nested_feed_forward_ref(x, token_mask, w1, b1, w2, b2,
                                  num_experts=num_experts)

    # f32 compute path: same semantics as the module, tight tolerance.
    out_f32 = nested_feed_forward(x, token_mask, w1, b1, w2, b2,
                                  num_experts=num_experts,
                                  compute_dtype=jnp.float32)
    out_f32 = jax.block_until_ready(out_f32)
    np.testing.assert_allclose(np.asarray(out_f32), np.asarray(ref),
                               rtol=1e-5, atol=1e-5)

    # default fast path: bf16 operands on the MXU with f32 accumulation.
    out_bf16 = nested_feed_forward(x, token_mask, w1, b1, w2, b2,
                                   num_experts=num_experts)
    out_bf16 = jax.block_until_ready(out_bf16)
    np.testing.assert_allclose(np.asarray(out_bf16), np.asarray(ref),
                               rtol=3e-2, atol=3e-2)

    print("KERNEL_OK")
</pallas_src>

<mosaic_0001>
module attributes {stable_mosaic.version = 11 : i64} {
  func.func @nested_ffn_kernel_resident(%arg0: i32, %arg1: memref<8x1xi32, #tpu.memory_space<vmem>>, %arg2: memref<8x32xf32, #tpu.memory_space<vmem>>, %arg3: memref<32x128xf32, #tpu.memory_space<vmem>>, %arg4: memref<1x128xf32, #tpu.memory_space<vmem>>, %arg5: memref<128x32xf32, #tpu.memory_space<vmem>>, %arg6: memref<1x32xf32, #tpu.memory_space<vmem>>, %arg7: memref<8x32xf32, #tpu.memory_space<vmem>>) attributes {dimension_semantics = [#tpu.dimension_semantics<parallel>], iteration_bounds = array<i64: 2>, scalar_prefetch = 0 : i64, scratch_operands = 0 : i64, tpu.core_type = #tpu.core_type<tc>, window_params = [{transform_indices = @transform_0, window_bounds = array<i64: 8, 1>}, {transform_indices = @transform_1, window_bounds = array<i64: 8, 32>}, {pipeline_mode = #tpu.pipeline_mode<synchronous>, transform_indices = @transform_2, window_bounds = array<i64: 32, 128>}, {pipeline_mode = #tpu.pipeline_mode<synchronous>, transform_indices = @transform_3, window_bounds = array<i64: 1, 128>}, {pipeline_mode = #tpu.pipeline_mode<synchronous>, transform_indices = @transform_4, window_bounds = array<i64: 128, 32>}, {pipeline_mode = #tpu.pipeline_mode<synchronous>, transform_indices = @transform_5, window_bounds = array<i64: 1, 32>}, {transform_indices = @transform_6, window_bounds = array<i64: 8, 32>}]} {
    %c0 = arith.constant 0 : index
    %c0_0 = arith.constant 0 : index
    %0 = vector.load %arg2[%c0, %c0_0] : memref<8x32xf32, #tpu.memory_space<vmem>>, vector<8x32xf32>
    %c0_1 = arith.constant 0 : index
    %c0_2 = arith.constant 0 : index
    %1 = vector.load %arg3[%c0_1, %c0_2] : memref<32x128xf32, #tpu.memory_space<vmem>>, vector<32x128xf32>
    %cst = arith.constant dense<0.000000e+00> : vector<8x128xf32>
    %2 = tpu.matmul %0, %1, %cst {dimension_numbers = #tpu.dot_dimension_numbers<[1], [0], [0], [1], [0, 0, 1, 1], [], []>} : vector<8x32xf32>, vector<32x128xf32>, vector<8x128xf32> -> vector<8x128xf32>
    %c0_3 = arith.constant 0 : index
    %c0_4 = arith.constant 0 : index
    %3 = vector.load %arg4[%c0_3, %c0_4] : memref<1x128xf32, #tpu.memory_space<vmem>>, vector<1x128xf32>
    %4 = vector.broadcast %3 : vector<1x128xf32> to vector<8x128xf32>
    %5 = arith.addf %2, %4 : vector<8x128xf32>
    %cst_5 = arith.constant 5.000000e-01 : f32
    %6 = vector.broadcast %cst_5 : f32 to vector<8x128xf32>
    %7 = arith.mulf %6, %5 : vector<8x128xf32>
    %cst_6 = arith.constant 0.707106769 : f32
    %8 = vector.broadcast %cst_6 : f32 to vector<8x128xf32>
    %9 = arith.mulf %5, %8 : vector<8x128xf32>
    %10 = math.erf %9 : vector<8x128xf32>
    %cst_7 = arith.constant 1.000000e+00 : f32
    %11 = vector.broadcast %cst_7 : f32 to vector<8x128xf32>
    %12 = arith.addf %11, %10 : vector<8x128xf32>
    %13 = arith.mulf %7, %12 : vector<8x128xf32>
    %c0_8 = arith.constant 0 : index
    %c0_9 = arith.constant 0 : index
    %14 = vector.load %arg5[%c0_8, %c0_9] : memref<128x32xf32, #tpu.memory_space<vmem>>, vector<128x32xf32>
    %cst_10 = arith.constant dense<0.000000e+00> : vector<8x32xf32>
    %15 = tpu.matmul %13, %14, %cst_10 {dimension_numbers = #tpu.dot_dimension_numbers<[1], [0], [0], [1], [0, 0, 1, 1], [], []>} : vector<8x128xf32>, vector<128x32xf32>, vector<8x32xf32> -> vector<8x32xf32>
    %c0_11 = arith.constant 0 : index
    %c0_12 = arith.constant 0 : index
    %16 = vector.load %arg6[%c0_11, %c0_12] : memref<1x32xf32, #tpu.memory_space<vmem>>, vector<1x32xf32>
    %17 = vector.broadcast %16 : vector<1x32xf32> to vector<8x32xf32>
    %18 = arith.addf %15, %17 : vector<8x32xf32>
    %19 = tpu.iota {dimensions = array<i32: 1>} : vector<8x32xi32>
    %c0_13 = arith.constant 0 : index
    %c0_14 = arith.constant 0 : index
    %20 = vector.load %arg1[%c0_13, %c0_14] : memref<8x1xi32, #tpu.memory_space<vmem>>, vector<8x1xi32>
    %21 = vector.broadcast %20 : vector<8x1xi32> to vector<8x32xi32>
    %22 = arith.cmpi slt, %19, %21 : vector<8x32xi32>
    %cst_15 = arith.constant 0.000000e+00 : f32
    %23 = vector.broadcast %cst_15 : f32 to vector<8x32xf32>
    %24 = arith.select %22, %18, %23 : vector<8x32xi1>, vector<8x32xf32>
    %c0_16 = arith.constant 0 : index
    %c0_17 = arith.constant 0 : index
    %25 = vector.load %arg7[%c0_16, %c0_17] : memref<8x32xf32, #tpu.memory_space<vmem>>, vector<8x32xf32>
    tpu.vector_store %arg7[%c0_16, %c0_17], %24 {strides = array<i32>} : memref<8x32xf32, #tpu.memory_space<vmem>>, vector<8x32xf32>,
    return
  }
  func.func @transform_0(%arg0: i32) -> (i32, i32) {
    %c0_i32 = arith.constant 0 : i32
    %c0_i32_0 = arith.constant 0 : i32
    return %arg0, %c0_i32 : i32, i32
  }
  func.func @transform_1(%arg0: i32) -> (i32, i32) {
    %c0_i32 = arith.constant 0 : i32
    %c0_i32_0 = arith.constant 0 : i32
    return %arg0, %c0_i32 : i32, i32
  }
  func.func @transform_2(%arg0: i32) -> (i32, i32) {
    %c0_i32 = arith.constant 0 : i32
    %c0_i32_0 = arith.constant 0 : i32
    %c0_i32_1 = arith.constant 0 : i32
    return %c0_i32, %c0_i32_0 : i32, i32
  }
  func.func @transform_3(%arg0: i32) -> (i32, i32) {
    %c0_i32 = arith.constant 0 : i32
    %c0_i32_0 = arith.constant 0 : i32
    %c0_i32_1 = arith.constant 0 : i32
    return %c0_i32, %c0_i32_0 : i32, i32
  }
  func.func @transform_4(%arg0: i32) -> (i32, i32) {
    %c0_i32 = arith.constant 0 : i32
    %c0_i32_0 = arith.constant 0 : i32
    %c0_i32_1 = arith.constant 0 : i32
    return %c0_i32, %c0_i32_0 : i32, i32
  }
  func.func @transform_5(%arg0: i32) -> (i32, i32) {
    %c0_i32 = arith.constant 0 : i32
    %c0_i32_0 = arith.constant 0 : i32
    %c0_i32_1 = arith.constant 0 : i32
    return %c0_i32, %c0_i32_0 : i32, i32
  }
  func.func @transform_6(%arg0: i32) -> (i32, i32) {
    %c0_i32 = arith.constant 0 : i32
    %c0_i32_0 = arith.constant 0 : i32
    return %arg0, %c0_i32 : i32, i32
  }
}

</mosaic_0001>

<bundles_post_ra>
// kernel: tpu_custom_call.1
= control target key start
LH: loop header
LB: loop body
LE: loop exit
PB: predicated region body
PF: predicated region fallthrough
CT: control target
= control target key end

     0   :  { %11 = vsyncpa [#allocation3], 0  ;;  %s965_s0 = inlined_call_operand.vmem [shape: s32[16,1], index: 0, kind: input, shape index: {}]   ;;  %s966_s1 = inlined_call_operand.vmem [shape: f32[16,32], index: 1, kind: input, shape index: {}]   ;;  %s967_s2 = inlined_call_operand.vmem [shape: f32[32,128], index: 2, kind: input, shape index: {}]   ;;  %s968_s3 = inlined_call_operand.vmem [shape: f32[1,128], index: 3, kind: input, shape index: {}]   ;;  %s969_s4 = inlined_call_operand.vmem [shape: f32[128,32], index: 4, kind: input, shape index: {}]   ;;  %s970_s5 = inlined_call_operand.vmem [shape: f32[1,32], index: 5, kind: input, shape index: {}]   ;;  %s971_s6 = inlined_call_operand.hbm [shape: f32[16,32], index: 6, kind: output, shape index: {}]  }
   0x1   :  { %13 = vsyncpa [#allocation3 + $0x1], 0  ;;  %s770_s21 = smov 0   ;;  %s772_s22 = smov 0  }
   0x2   :  { %s774_s23 = smov 0   ;;  %s776_s24 = smov 0  }
   0x3 LB: > { %s791_s25 = sadd.s32 4294967295, %s729_s24   ;;  %s542_s26 = sadd.s32 4294967294, %s729_s24   ;;  %s729_s24 = sphi %s776_s24, %s977_s24   ;;  %s725_s23 = sphi %s774_s23, %s976_s23   ;;  %s721_s22 = sphi %s772_s22, %s975_s22   ;;  %s717_s21 = sphi %s770_s21, %s974_s21  }
   0x4   : > { %s795_s27 = sadd.s32 1, %s729_s24   ;;  %s162_s28 = sadd.s32 1, %s725_s23 }
   0x5   : > { %s159_s29 = ssub.s32 %s729_s24, %s795_s27  ;;  %p172_p0 = scmp.ne.s32.totalorder %s725_s23, %s721_s22 }
   0x6   : > { %p160_p1 = scmp.eq.s32.totalorder %s159_s29, 0  ;;  %p173_p2 = scmp.eq.s32.totalorder %s791_s25, 1 }
   0x7   : > { %p178_p3 = scmp.ne.s32.totalorder %s721_s22, %s717_s21  ;;  %p179_p4 = scmp.eq.s32.totalorder %s542_s26, 1 }
   0x8   : > { %s806_s30 = scalar_select %p160_p1, %s725_s23, %s162_s28  }
   0x9   : > { %p808_p5 = por %p173_p2, %p172_p0  ;;  %p812_p6 = por %p179_p4, %p178_p3 }
   0xa   : > { %p545_p7 = scmp.ge.s32.totalorder %s729_s24, 1  ;;  %p223_p8 = scmp.lt.s32.totalorder %s729_s24, 3 }
   0xc   : > { %p224_p9 = pnand %p545_p7, %p223_p8 }
   0xd   : > { %p256_p10 = scmp.lt.s32.totalorder (!%p224_p9), %s791_s25, 1  ;;  %s553_s28 = sshll.u32 (!%p224_p9), %s791_s25, 7 }
   0xe   : > { %227 = sbr.rel (%p224_p9) target bundleno = 452 (0x1c4), region = 44 }
  0x13   : > { %v268_v0 = vld [vmem:[%s967_s2 + $0x18] sm:$0xff]  ;;  %v731_v1 = vmov 0.0   ;;  %v267_v2 = vld [vmem:[%s967_s2 + $0x10] sm:$0xff]  ;;  %vm732_vm0 = vmmov 0   ;;  %s832_s15 = scalar_select %p256_p10, %s791_s25, 1  ;;  %v266_v5 = vld [vmem:[%s967_s2 + $0x8] sm:$0xff]  ;;  %v448_v33 = vlaneseq }
  0x14   : > { %578 = vmatprep.subr.mxu0 %v731_v1  ;;  %586 = vmatprep.mubr.msk.f32.mxu0 %vm732_vm0, %v731_v1  ;;  %v370_v3 = vld [vmem:[%s969_s4 + $0x78] sm:$0xff]  ;;  %v369_v4 = vld [vmem:[%s969_s4 + $0x70] sm:$0xff]  ;;  %v368_v6 = vld [vmem:[%s969_s4 + $0x68] sm:$0xff]  ;;  %vm276_vm1 = vcmask 261120   ;;  %v733_v22 = vmov 0   ;;  %s734_s25 = smov [#allocation2]  }
  0x15   : > { %579 = vmatpush3.msra.mxu0 %v268_v0  ;;  %589 = vmatprep.subr.mxu1 %v731_v1  ;;  %s547_s20 = sshll.u32 %s832_s15, 3  ;;  %v265_v7 = vld [vmem:[%s967_s2] sm:$0xff]  ;;  %v366_v10 = vld [vmem:[%s969_s4 + $0x58] sm:$0xff]  ;;  %v365_v11 = vld [vmem:[%s969_s4 + $0x50] sm:$0xff]  ;;  %s253_s15 = sand.u32 1, %s721_s22   ;;  %v449_v34 = vand.u32 127, %v448_v33 }
  0x16   : > { %580 = vmatprep.subr.mxu0 %v731_v1  ;;  %590 = vmatpush3.msra.mxu1 %v370_v3  ;;  %s263_s12 = scalar_lea.vmem %s966_s1, %s547_s20  ;;  %v367_v9 = vld [vmem:[%s969_s4 + $0x60] sm:$0xff]  ;;  %v364_v12 = vld [vmem:[%s969_s4 + $0x48] sm:$0xff]  ;;  %v362_v14 = vld [vmem:[%s969_s4 + $0x38] sm:$0xff]  ;;  %s259_s16 = scalar_lea.vmem %s965_s0, %s547_s20 }
  0x17   : > { %581 = vmatpush3.msra.mxu0 %v267_v2  ;;  %591 = vmatprep.subr.mxu1 %v731_v1  ;;  %v264_v8 = vld [vmem:[%s263_s12] sm:$0xff]  ;;  %v361_v15 = vld [vmem:[%s969_s4 + $0x30] sm:$0xff]  ;;  %v360_v16 = vld [vmem:[%s969_s4 + $0x28] sm:$0xff]  ;;  %s546_s20 = sshll.u32 %s253_s15, 3  ;;  %s929_s12 = scalar_lea.hbm %s971_s6, %s553_s28 }
  0x18   : > { %582 = vmatprep.subr.mxu0 %v731_v1  ;;  %592 = vmatpush3.msra.mxu1 %v369_v4  ;;  %v363_v13 = vld [vmem:[%s969_s4 + $0x40] sm:$0xff]  ;;  %v358_v18 = vld [vmem:[%s969_s4 + $0x18] sm:$0xff]  ;;  %v357_v19 = vld [vmem:[%s969_s4 + $0x10] sm:$0xff]  ;;  %s255_s29 = scalar_lea.vmem [#allocation2], %s546_s20  ;;  %s458_s13 = scalar_lea.sflag [#allocation3], %s253_s15 }
  0x19   : > { %583 = vmatpush3.msra.mxu0 %v266_v5  ;;  %593 = vmatprep.subr.mxu1 %v731_v1  ;;  %v359_v17 = vld [vmem:[%s969_s4 + $0x20] sm:$0xff]  ;;  %v356_v20 = vld [vmem:[%s969_s4 + $0x8] sm:$0xff]  ;;  %s471_s9 = sshll.u32 %s255_s29, 4  ;;  %s472_s9 = int_to_ptr.vmem [resolvable:$true] %s471_s9 }
  0x1a   : > { %584 = vmatprep.subr.mxu0 %v731_v1  ;;  %594 = vmatpush3.msra.mxu1 %v368_v6  ;;  %v355_v21 = vld [vmem:[%s969_s4] sm:$0xff]  ;;  %s669_s14 = scalar_lea.vmem %s472_s9, 128 }
  0x1b   : > { %585 = vmatpush3.msra.mxu0 %v265_v7  ;;  %595 = vmatprep.subr.mxu1 %v731_v1  ;;  %v450_v23 = vld [vmem:[%s259_s16] sm:$0xff]  ;;  %p670_p11 = scmp.ne.s32.totalorder %s472_s9, %s669_s14  ;;  %s673_s16 = sshll.u32 %s734_s25, 4  ;;  %s674_s16 = int_to_ptr.vmem [resolvable:$false] %s673_s16 }
  0x1c   : > { %587 = vmatmul.mubr.msk.f32.vlgmr.msra.gmra.mxu0 %vm276_vm1, %v264_v8  ;;  %596 = vmatpush3.msra.mxu1 %v367_v9  ;;  %v549_v24 = vld [vmem:[%s968_s3] ss:$0 sm:$0xff]  ;;  %s675_s17 = scalar_lea.vmem %s674_s16, 256  ;;  %p676_p0 = scmp.lt.s32.totalorder %s472_s9, %s674_s16 }
  0x1d   : > { %597 = vmatprep.subr.mxu1 %v731_v1  ;;  %621 = vmatprep.mubr.msk.f32.mxu1 %vm732_vm0, %v731_v1  ;;  %v551_v36 = vld [vmem:[%s970_s5] ss:$0 sm:$0xff]  ;;  %p671_p12 = pnand %p670_p11, %p808_p5  ;;  %p677_p1 = scmp.lt.s32.totalorder %s675_s17, %s669_s14 }
  0x1e   : > { %598 = vmatpush3.msra.mxu1 %v366_v10  ;;  %666 = vset.pattern.permute.xlu0 %v733_v22 }
  0x1f   : > { %599 = vmatprep.subr.mxu1 %v731_v1  ;;  %452 = vperm.xlu0 %666, %v450_v23   ;;  %p672_p13 = pneg %p671_p12  ;;  %p678_p2 = por %p677_p1, %p676_p0 }
  0x20   : > { %600 = vmatpush3.msra.mxu1 %v365_v11 }
  0x21   : > { %601 = vmatprep.subr.mxu1 %v731_v1  ;;  %p679_p3 = pnand %p678_p2, %p672_p13 }
  0x22   : > { %602 = vmatpush3.msra.mxu1 %v364_v12 }
  0x23   : > { %603 = vmatprep.subr.mxu1 %v731_v1 }
  0x24   : > { %604 = vmatpush3.msra.mxu1 %v363_v13 }
  0x25   : > { %605 = vmatprep.subr.mxu1 %v731_v1 }
  0x26   : > { %606 = vmatpush3.msra.mxu1 %v362_v14 }
  0x27   : > { %607 = vmatprep.subr.mxu1 %v731_v1 }
  0x28   : > { %608 = vmatpush3.msra.mxu1 %v361_v15 }
  0x29   : > { %609 = vmatprep.subr.mxu1 %v731_v1 }
  0x2a   : > { %610 = vmatpush3.msra.mxu1 %v360_v16 }
  0x2b   : > { %611 = vmatprep.subr.mxu1 %v731_v1 }
  0x2c   : > { %612 = vmatpush3.msra.mxu1 %v359_v17 }
  0x2d   : > { %613 = vmatprep.subr.mxu1 %v731_v1 }
  0x2e   : > { %614 = vmatpush3.msra.mxu1 %v358_v18 }
  0x2f   : > { %615 = vmatprep.subr.mxu1 %v731_v1 }
  0x30   : > { %616 = vmatpush3.msra.mxu1 %v357_v19 }
  0x31   : > { %617 = vmatprep.subr.mxu1 %v731_v1 }
  0x32   : > { %618 = vmatpush3.msra.mxu1 %v356_v20 }
  0x33   : > { %619 = vmatprep.subr.mxu1 %v731_v1 }
  0x34   : > { %620 = vmatpush3.msra.mxu1 %v355_v21 }
  0x9a   : > { %v453_v35 = vpop.permute.xlu0 %452 }
  0x9b   : > { %vm454_vm2 = vcmp.lt.s32.totalorder %v449_v34, %v453_v35 }
  0xdc   : > { %v346_v25 = vpop.f32.mrf.mxu0 }
  0xdd   : > { %v347_v26 = vadd.f32 %v549_v24, %v346_v25 }
  0xde   : > { %v588_v27 = vpop.f32.mrf.mxu0 }
  0xdf   : > { %v351_v28 = vmul.f32 0.70710677, %v347_v26  ;;  %v350_v30 = vmul.f32 0.5, %v347_v26 }
  0xe1   : > { %667 = verf.f32 %v351_v28 }
  0xee   : > { %v668_v29 = vpop.eup %667 }
  0xef   : > { %v353_v31 = vadd.f32 1.0, %v668_v29 }
  0xf1   : > { %v354_v32 = vmul.f32 %v353_v31, %v350_v30 }
  0xf3   : > { %622 = vmatmul.mubr.f32.vlgmr.msra.gmra.mxu1 %v354_v32 }
 0x1b3   : > { %v444_v37 = vpop.f32.mrf.mxu1 }
 0x1b4   : > { %v445_v38 = vadd.f32 %v551_v36, %v444_v37 }
 0x1b5   : > { %v623_v39 = vpop.f32.mrf.mxu1 }
 0x1b6   : > { %v455_v40 = vsel %vm454_vm2, %v445_v38, 0.0 }
 0x1b7   : > { %456 = vst.msk [vmem:[%s255_s29] sm:$0xff] %vm276_vm1, %v455_v40 }
 0x1b8   : > { %682 = shalt.err (!%p679_p3)
}
 0x1b9   : > { %s683_s18 = scalar_lea.hbm %s929_s12, 128  ;;  %s687_s19 = scalar_lea.hbm %s971_s6, 256 }
 0x1ba   : > { %p684_p4 = scmp.ne.s32.totalorder %s929_s12, %s683_s18  ;;  %p688_p9 = scmp.lt.s32.totalorder %s929_s12, %s971_s6 }
 0x1bb   : > { %p689_p10 = scmp.lt.s32.totalorder %s687_s19, %s683_s18 }
 0x1bc   : > { %p685_p7 = pnand %p684_p4, %p808_p5 }
 0x1bd   : > { %p690_p11 = por %p689_p10, %p688_p9 }
 0x1be   : > { %p686_p8 = pneg %p685_p7 }
 0x1c0   : > { %p691_p12 = pnand %p690_p11, %p686_p8 }
 0x1c2   : > { %694 = shalt.err (!%p691_p12)
}
 0x1c3   : > { %624 = dma.vmem_to_hbm [thread:$0]  (%p808_p5), %s472_s9, 128, %s929_s12, %s458_s13  }
 0x1c4 PF: > { %p630_p13 = scmp.ge.s32.totalorder %s729_s24, 2  ;;  %s483_s29 = sand.u32 1, %s717_s21  }
 0x1c5   : > { %s484_s10 = scalar_lea.sflag [#allocation3], %s483_s29 }
 0x1c6   : > { %p627_p0 = pnand %p630_p13, %p812_p6 }
 0x1c8   : > { %p628_p1 = pneg %p627_p0 }
 0x1ca   : > { %712 = dma.done.wait (%p628_p1), %s484_s10, 128  }
 0x1cb   : > { %714 = vsyncadd (%p628_p1), %s484_s10, 4294967168  ;;  %p16_p2 = scmp.ge.s32.totalorder %s795_s27, 4   ;;  %s974_s21 = smov %s721_s22 }
 0x1cc   : > { %s975_s22 = smov %s725_s23  ;;  %s976_s23 = smov %s806_s30 }
 0x1cd   : > { %s977_s24 = smov %s795_s27  ;;  %18 = sbr.rel (!%p16_p2) target bundleno = 3 (0x3), region = 82 }
 0x1d2   :  { %489 = vsyncpa [#allocation3], 1 }
 0x1d3   :  { %491 = vsyncpa [#allocation3 + $0x1], 1 }

</bundles_post_ra>
